<compile_context>
chip_gen: v6e
topology: v6e:2x2x1
jax: 0.10.0
libtpu: 0.0.40
codegen_flags: <defaults>
</compile_context>

<pallas_src>
import functools

import jax
import jax.numpy as jnp
from jax.experimental import pallas as pl
from jax.experimental.pallas import tpu as pltpu


def _round_up(n, m):
    return ((n + m - 1) // m) * m


def _cdiv(a, b):
    return -(-a // b)


def _lstm_kernel(x_ref, wih_ref, whh_ref, b_ref, wfc_ref, bfc_ref, out_ref,
                 xp_sc, hs_sc, h_sc, c_sc, *,
                 chunk_steps, batch_pad, gate_width, packed, unroll):
    """One time-chunk of the fused LSTM.

    x_ref   : (Tc*Bp, D)     pipelined input chunk (time-major, batch padded)
    wih_ref : (D, 4*Hg)      W_ih^T, gate blocks [o|i|f|g], each zero-padded H->Hg
    whh_ref : (SW, 4*Hg)     W_hh^T in the h-state layout (SW = 4*Hg packed, Hg aligned)
    b_ref   : (1, 4*Hg)      b_ih + b_hh (f32)
    wfc_ref : (SW, Op)       fc.weight^T in the h-state layout
    bfc_ref : (1, Op)        fc.bias (f32)
    out_ref : (Tc*Bp, Op)    pipelined output chunk
    xp_sc   : (Tc*Bp, 4*Hg)  chunk input projection (f32)
    hs_sc   : (Tc*Bp, SW)    chunk-local hidden-state history (compute dtype)
    h_sc/c_sc: (Bp, SW)      recurrent carry, persists across grid iterations (f32)
    """
    Tc, Bp, Hg = chunk_steps, batch_pad, gate_width
    Wg = 4 * Hg
    cdt = whh_ref.dtype

    # Zero the recurrent carry on the first chunk only; scratch persists afterwards.
    @pl.when(pl.program_id(0) == 0)
    def _init():
        h_sc[...] = jnp.zeros_like(h_sc)
        c_sc[...] = jnp.zeros_like(c_sc)

    # (1) Input projection for the whole chunk: one big MXU matmul (bf16 in, f32 acc),
    #     bias folded in here -- hoisted off the serial critical path.
    xp_sc[...] = (
        jnp.dot(x_ref[...], wih_ref[...], preferred_element_type=jnp.float32)
        + b_ref[...]
    )

    if packed:
        # Packed layout (H not a multiple of 128): gate blocks are Hg lanes wide,
        # ordered [o | i | f | g].  State layout inside a (Bp, 4*Hg) row of lanes:
        #   h lives in block 0, c lives in block 2, every other lane is held at 0.
        lane = jax.lax.broadcasted_iota(jnp.int32, (Bp, Wg), 1)
        g_mask = lane >= 3 * Hg                        # tanh (cell-candidate) block
        c_mask = (lane >= 2 * Hg) & (lane < 3 * Hg)    # c's home block

    def step(t, carry):
        h, c = carry                                   # f32, (Bp, SW)
        row = pl.multiple_of(t * Bp, Bp)               # sublane-aligned chunk row
        gates = xp_sc[pl.ds(row, Bp), :] + jnp.dot(
            h.astype(cdt), whh_ref[...], preferred_element_type=jnp.float32)
        if packed:
            # One EUP tanh pass yields both sigmoid (0.5*tanh(0.5x)+0.5) and tanh.
            z = jnp.where(g_mask, gates, 0.5 * gates)
            tz = jnp.tanh(z)
            act = jnp.where(g_mask, tz, 0.5 * tz + 0.5)   # [s(o)|s(i)|s(f)|tanh(g)]
            # i*g via a half-width roll (direction-agnostic: blocks 1 AND 3 get i*g),
            # then a one-block roll lands i*g in c's home block from either side.
            ig = act * pltpu.roll(act, 2 * Hg, axis=1)
            ig_c = pltpu.roll(ig, Hg, axis=1)
            c_new = jnp.where(c_mask, act * c + ig_c, 0.0)          # f*c + i*g @ blk2
            h_new = act * pltpu.roll(jnp.tanh(c_new), 2 * Hg, axis=1)  # o*tanh(c') @ blk0
        else:
            # H multiple of 128: every gate block is lane-aligned; slice directly.
            sig = lambda v: 0.5 * jnp.tanh(0.5 * v) + 0.5   # 1 EUP push instead of 2
            o_g = sig(gates[:, 0 * Hg:1 * Hg])
            i_g = sig(gates[:, 1 * Hg:2 * Hg])
            f_g = sig(gates[:, 2 * Hg:3 * Hg])
            g_g = jnp.tanh(gates[:, 3 * Hg:4 * Hg])
            c_new = f_g * c + i_g * g_g
            h_new = o_g * jnp.tanh(c_new)
        hs_sc[pl.ds(row, Bp), :] = h_new.astype(hs_sc.dtype)
        return h_new, c_new

    h_last, c_last = jax.lax.fori_loop(
        0, Tc, step, (h_sc[...], c_sc[...]), unroll=unroll)
    h_sc[...] = h_last
    c_sc[...] = c_last

    # (3) Dropout is identity in eval mode; per-chunk FC head -> one lane-dense store.
    out_ref[...] = (
        jnp.dot(hs_sc[...], wfc_ref[...], preferred_element_type=jnp.float32)
        + bfc_ref[...]
    ).astype(out_ref.dtype)


def _pad_params(params, H, Hg, O, Op, packed, compute_dtype):
    """Reorder gates to [o|i|f|g], zero-pad each gate H->Hg, pad FC O->Op.

    Padded gate columns carry zero weight/bias (their pre-activations are 0, the g
    block gets tanh(0)=0, so padded c/h lanes stay exactly 0); padded W_hh / W_fc
    rows are zero, so padding never leaks into real lanes.
    """
    wih, whh, b, wfc, bfc = params   # (D,4H), (H,4H), (1,4H), (H,O), (1,O); order i,f,g,o
    order = (3, 0, 1, 2)             # new block k <- old gate order[k]  ->  [o,i,f,g]

    def regate(w):
        blocks = [w[..., g * H:(g + 1) * H] for g in order]
        pad = [(0, 0)] * (w.ndim - 1) + [(0, Hg - H)]
        return jnp.concatenate([jnp.pad(blk, pad) for blk in blocks], axis=-1)

    wih_p = regate(wih)                                       # (D, 4Hg)
    whh_p = regate(jnp.pad(whh, ((0, Hg - H), (0, 0))))       # (Hg, 4Hg)
    b_p = regate(b)                                           # (1, 4Hg)
    wfc_p = jnp.pad(wfc, ((0, Hg - H), (0, Op - O)))          # (Hg, Op)
    bfc_p = jnp.pad(bfc, ((0, 0), (0, Op - O)))               # (1, Op)
    if packed:
        # Packed path: h state is a full (Bp, 4Hg) row with the real h in block 0 and
        # zeros elsewhere, so the contraction dims get zero rows Hg -> 4Hg.
        whh_p = jnp.pad(whh_p, ((0, 3 * Hg), (0, 0)))         # (4Hg, 4Hg)
        wfc_p = jnp.pad(wfc_p, ((0, 3 * Hg), (0, 0)))         # (4Hg, Op)
    return (wih_p.astype(compute_dtype), whh_p.astype(compute_dtype),
            b_p.astype(jnp.float32), wfc_p.astype(compute_dtype),
            bfc_p.astype(jnp.float32))


def lstm_forward(x, params, *, hidden_dim, output_dim, time_chunk=64,
                 compute_dtype=jnp.bfloat16):
    """x: (B, T, D) float32.  Returns (B, T, output_dim) float32.  Eval-mode forward."""
    B, T, D = x.shape
    H, O = hidden_dim, output_dim

    packed = (H % 128 != 0)                 # pack gates when per-gate 128-padding wastes lanes
    Hg = H if not packed else _round_up(H, 32)   # per-gate lane width; 4*Hg % 128 == 0
    Wg = 4 * Hg
    SW = Wg if packed else Hg               # carried h/c state width
    Op = _round_up(O, 128)                  # lane-dense output store
    Bp = _round_up(B, 8)                    # sublane-aligned per-step rows

    # Time chunking: VMEM footprint is O(Tc); chunks are pipelined through the grid.
    Nc = _cdiv(T, max(1, min(time_chunk, T)))
    Tc = _cdiv(T, Nc)
    Tp = Nc * Tc

    pp = _pad_params(params, H, Hg, O, Op, packed, compute_dtype)
    wih_p, whh_p, b_p, wfc_p, bfc_p = pp

    # time-major, pad time/batch, flatten to (Tp*Bp, D), cast to the matmul dtype
    x_tm = jnp.transpose(x.astype(compute_dtype), (1, 0, 2))       # (T, B, D)
    x_tm = jnp.pad(x_tm, ((0, Tp - T), (0, Bp - B), (0, 0)))       # (Tp, Bp, D)
    x2d = jnp.reshape(x_tm, (Tp * Bp, D))

    # VMEM budget: resident weights + double-buffered x/out chunks + chunk scratch.
    csz = jnp.dtype(compute_dtype).itemsize
    est = (sum(int(p.size) * p.dtype.itemsize for p in pp)
           + 2 * Tc * Bp * D * csz          # pipelined x chunks
           + 2 * Tc * Bp * Op * 4           # pipelined out chunks
           + Tc * Bp * Wg * 4               # xp_sc
           + Tc * Bp * SW * csz             # hs_sc
           + 2 * Bp * SW * 4)               # h/c carry
    vmem_bytes = min(max(int(est * 1.5) + (8 << 20), 16 << 20), 100 << 20)

    unroll = Tc if Tc <= 16 else 8          # bounded unroll for long chunks

    kernel = functools.partial(
        _lstm_kernel, chunk_steps=Tc, batch_pad=Bp, gate_width=Hg,
        packed=packed, unroll=unroll)

    resident = pl.BlockSpec(memory_space=pltpu.MemorySpace.VMEM)   # whole-array weights
    out2d = pl.pallas_call(
        kernel,
        out_shape=jax.ShapeDtypeStruct((Tp * Bp, Op), jnp.float32),
        grid=(Nc,),
        in_specs=[
            pl.BlockSpec((Tc * Bp, D), lambda n: (n, 0)),          # x: per-chunk pipeline
            resident, resident, resident, resident, resident,       # weights: VMEM residents
        ],
        out_specs=pl.BlockSpec((Tc * Bp, Op), lambda n: (n, 0)),    # out: per-chunk pipeline
        scratch_shapes=[
            pltpu.VMEM((Tc * Bp, Wg), jnp.float32),    # xp_sc: chunk input projection
            pltpu.VMEM((Tc * Bp, SW), compute_dtype),  # hs_sc: chunk h history
            pltpu.VMEM((Bp, SW), jnp.float32),         # h carry (persists across chunks)
            pltpu.VMEM((Bp, SW), jnp.float32),         # c carry
        ],
        compiler_params=pltpu.CompilerParams(
            dimension_semantics=("arbitrary",),        # sequential time recurrence
            vmem_limit_bytes=vmem_bytes),
    )(x2d, wih_p, whh_p, b_p, wfc_p, bfc_p)

    out = jnp.reshape(out2d, (Tp, Bp, Op))[:T, :B, :O]             # drop all padding
    return jnp.transpose(out, (1, 0, 2))                           # (B, T, O)


def init_params(key, input_dim, hidden_dim, output_dim):
    """Deterministic init matching PyTorch parameter shapes (transposed for row-vector matmuls)."""
    D, H, O = input_dim, hidden_dim, output_dim
    k1, k2, k3, k4, k5, k6 = jax.random.split(key, 6)
    s = 1.0 / jnp.sqrt(H)
    wih = jax.random.uniform(k1, (D, 4 * H), jnp.float32, -s, s)    # = weight_ih_l0.T
    whh = jax.random.uniform(k2, (H, 4 * H), jnp.float32, -s, s)    # = weight_hh_l0.T
    b_ih = jax.random.uniform(k3, (1, 4 * H), jnp.float32, -s, s)
    b_hh = jax.random.uniform(k4, (1, 4 * H), jnp.float32, -s, s)
    wfc = jax.random.uniform(k5, (H, O), jnp.float32, -s, s)        # = fc.weight.T
    bfc = jax.random.uniform(k6, (1, O), jnp.float32, -s, s)
    return (wih, whh, b_ih + b_hh, wfc, bfc)


def lstm_reference(x, params, *, hidden_dim, output_dim):
    """Pure-JAX reference (lax.scan) mirroring torch.nn.LSTM + Linear (eval mode)."""
    wih, whh, b, wfc, bfc = params
    H = hidden_dim
    B = x.shape[0]

    def step(carry, x_t):
        h, c = carry
        gates = x_t @ wih + h @ whh + b
        i = jax.nn.sigmoid(gates[:, 0 * H:1 * H])
        f = jax.nn.sigmoid(gates[:, 1 * H:2 * H])
        g = jnp.tanh(gates[:, 2 * H:3 * H])
        o = jax.nn.sigmoid(gates[:, 3 * H:4 * H])
        c = f * c + i * g
        h = o * jnp.tanh(c)
        return (h, c), h

    h0 = jnp.zeros((B, H), jnp.float32)
    c0 = jnp.zeros((B, H), jnp.float32)
    _, hs = jax.lax.scan(step, (h0, c0), jnp.transpose(x, (1, 0, 2)))
    hs = jnp.transpose(hs, (1, 0, 2))          # (B, T, H)
    return hs @ wfc + bfc                      # dropout is identity in eval


if __name__ == "__main__":
    # Small shapes consistent with the module forward: x is (batch, seq, input_dim).
    B, T, D, H, O = 2, 8, 16, 32, 8

    key = jax.random.PRNGKey(0)
    kx, kp = jax.random.split(key)
    x = jax.random.normal(kx, (B, T, D), jnp.float32)
    params = init_params(kp, D, H, O)
    ref = lstm_reference(x, params, hidden_dim=H, output_dim=O)

    # Strict correctness check in f32 (time_chunk=4 -> 2 chunks, exercising the
    # pipelined grid and the cross-chunk h/c carry).
    out_f32 = lstm_forward(x, params, hidden_dim=H, output_dim=O,
                           time_chunk=4, compute_dtype=jnp.float32)
    out_f32 = jax.block_until_ready(out_f32)
    assert out_f32.shape == (B, T, O), out_f32.shape
    assert jnp.allclose(out_f32, ref, atol=2e-4, rtol=2e-4), \
        float(jnp.max(jnp.abs(out_f32 - ref)))

    # Default mixed-precision path (bf16 weights/x/h-history, f32 accumulation);
    # tolerance is bf16-roundoff-scale.
    out_bf16 = lstm_forward(x, params, hidden_dim=H, output_dim=O, time_chunk=4)
    out_bf16 = jax.block_until_ready(out_bf16)
    assert out_bf16.shape == (B, T, O), out_bf16.shape
    assert jnp.allclose(out_bf16, ref, atol=5e-2, rtol=5e-2), \
        float(jnp.max(jnp.abs(out_bf16 - ref)))

    print("KERNEL_OK")
</pallas_src>

<mosaic_0001>
module attributes {stable_mosaic.version = 11 : i64} {
  func.func @_lstm_kernel(%arg0: i32, %arg1: memref<32x16xf32, #tpu.memory_space<vmem>>, %arg2: memref<16x128xf32, #tpu.memory_space<vmem>>, %arg3: memref<128x128xf32, #tpu.memory_space<vmem>>, %arg4: memref<1x128xf32, #tpu.memory_space<vmem>>, %arg5: memref<128x128xf32, #tpu.memory_space<vmem>>, %arg6: memref<1x128xf32, #tpu.memory_space<vmem>>, %arg7: memref<32x128xf32, #tpu.memory_space<vmem>>, %arg8: memref<32x128xf32, #tpu.memory_space<vmem>>, %arg9: memref<32x128xf32, #tpu.memory_space<vmem>>, %arg10: memref<8x128xf32, #tpu.memory_space<vmem>>, %arg11: memref<8x128xf32, #tpu.memory_space<vmem>>) attributes {dimension_semantics = [#tpu.dimension_semantics<arbitrary>], iteration_bounds = array<i64: 2>, scalar_prefetch = 0 : i64, scratch_operands = 4 : i64, tpu.core_type = #tpu.core_type<tc>, window_params = [{transform_indices = @transform_0, window_bounds = array<i64: 32, 16>}, {pipeline_mode = #tpu.pipeline_mode<synchronous>, transform_indices = @transform_1, window_bounds = array<i64: 16, 128>}, {pipeline_mode = #tpu.pipeline_mode<synchronous>, transform_indices = @transform_2, window_bounds = array<i64: 128, 128>}, {pipeline_mode = #tpu.pipeline_mode<synchronous>, transform_indices = @transform_3, window_bounds = array<i64: 1, 128>}, {pipeline_mode = #tpu.pipeline_mode<synchronous>, transform_indices = @transform_4, window_bounds = array<i64: 128, 128>}, {pipeline_mode = #tpu.pipeline_mode<synchronous>, transform_indices = @transform_5, window_bounds = array<i64: 1, 128>}, {transform_indices = @transform_6, window_bounds = array<i64: 32, 128>}]} {
    %c0_i32 = arith.constant 0 : i32
    %0 = arith.cmpi eq, %arg0, %c0_i32 : i32
    %1 = arith.extui %0 : i1 to i32
    %c0_i32_0 = arith.constant 0 : i32
    %2 = arith.cmpi ne, %1, %c0_i32_0 : i32
    scf.if %2 {
      %cst_77 = arith.constant 0.000000e+00 : f32
      %141 = vector.broadcast %cst_77 : f32 to vector<8x128xf32>
      %c0_78 = arith.constant 0 : index
      %c0_79 = arith.constant 0 : index
      %142 = vector.load %arg10[%c0_78, %c0_79] : memref<8x128xf32, #tpu.memory_space<vmem>>, vector<8x128xf32>
      tpu.vector_store %arg10[%c0_78, %c0_79], %141 {strides = array<i32>} : memref<8x128xf32, #tpu.memory_space<vmem>>, vector<8x128xf32>,
      %cst_80 = arith.constant 0.000000e+00 : f32
      %143 = vector.broadcast %cst_80 : f32 to vector<8x128xf32>
      %c0_81 = arith.constant 0 : index
      %c0_82 = arith.constant 0 : index
      %144 = vector.load %arg11[%c0_81, %c0_82] : memref<8x128xf32, #tpu.memory_space<vmem>>, vector<8x128xf32>
      tpu.vector_store %arg11[%c0_81, %c0_82], %143 {strides = array<i32>} : memref<8x128xf32, #tpu.memory_space<vmem>>, vector<8x128xf32>,
    } else {
    }
    %c0 = arith.constant 0 : index
    %c0_1 = arith.constant 0 : index
    %3 = vector.load %arg1[%c0, %c0_1] : memref<32x16xf32, #tpu.memory_space<vmem>>, vector<32x16xf32>
    %c0_2 = arith.constant 0 : index
    %c0_3 = arith.constant 0 : index
    %4 = vector.load %arg2[%c0_2, %c0_3] : memref<16x128xf32, #tpu.memory_space<vmem>>, vector<16x128xf32>
    %cst = arith.constant dense<0.000000e+00> : vector<32x128xf32>
    %5 = tpu.matmul %3, %4, %cst {dimension_numbers = #tpu.dot_dimension_numbers<[1], [0], [0], [1], [0, 0, 1, 1], [], []>} : vector<32x16xf32>, vector<16x128xf32>, vector<32x128xf32> -> vector<32x128xf32>
    %c0_4 = arith.constant 0 : index
    %c0_5 = arith.constant 0 : index
    %6 = vector.load %arg4[%c0_4, %c0_5] : memref<1x128xf32, #tpu.memory_space<vmem>>, vector<1x128xf32>
    %7 = vector.broadcast %6 : vector<1x128xf32> to vector<32x128xf32>
    %8 = arith.addf %5, %7 : vector<32x128xf32>
    %c0_6 = arith.constant 0 : index
    %c0_7 = arith.constant 0 : index
    %9 = vector.load %arg8[%c0_6, %c0_7] : memref<32x128xf32, #tpu.memory_space<vmem>>, vector<32x128xf32>
    tpu.vector_store %arg8[%c0_6, %c0_7], %8 {strides = array<i32>} : memref<32x128xf32, #tpu.memory_space<vmem>>, vector<32x128xf32>,
    %10 = tpu.iota {dimensions = array<i32: 1>} : vector<8x128xi32>
    %c96_i32 = arith.constant 96 : i32
    %11 = vector.broadcast %c96_i32 : i32 to vector<8x128xi32>
    %12 = arith.cmpi sge, %10, %11 : vector<8x128xi32>
    %c64_i32 = arith.constant 64 : i32
    %13 = vector.broadcast %c64_i32 : i32 to vector<8x128xi32>
    %14 = arith.cmpi sge, %10, %13 : vector<8x128xi32>
    %c96_i32_8 = arith.constant 96 : i32
    %15 = vector.broadcast %c96_i32_8 : i32 to vector<8x128xi32>
    %16 = arith.cmpi slt, %10, %15 : vector<8x128xi32>
    %17 = arith.andi %14, %16 : vector<8x128xi1>
    %c0_9 = arith.constant 0 : index
    %c0_10 = arith.constant 0 : index
    %18 = vector.load %arg10[%c0_9, %c0_10] : memref<8x128xf32, #tpu.memory_space<vmem>>, vector<8x128xf32>
    %c0_11 = arith.constant 0 : index
    %c0_12 = arith.constant 0 : index
    %19 = vector.load %arg11[%c0_11, %c0_12] : memref<8x128xf32, #tpu.memory_space<vmem>>, vector<8x128xf32>
    %c0_i32_13 = arith.constant 0 : i32
    %c8_i32 = arith.constant 8 : i32
    %20 = arith.muli %c0_i32_13, %c8_i32 : i32
    %21 = tpu.assume_multiple %20, 8 : i32
    %22 = arith.index_cast %21 : i32 to index
    %c0_14 = arith.constant 0 : index
    %23 = vector.load %arg8[%22, %c0_14] : memref<32x128xf32, #tpu.memory_space<vmem>>, vector<8x128xf32>
    %c0_15 = arith.constant 0 : index
    %c0_16 = arith.constant 0 : index
    %24 = vector.load %arg3[%c0_15, %c0_16] : memref<128x128xf32, #tpu.memory_space<vmem>>, vector<128x128xf32>
    %cst_17 = arith.constant dense<0.000000e+00> : vector<8x128xf32>
    %25 = tpu.matmul %18, %24, %cst_17 {dimension_numbers = #tpu.dot_dimension_numbers<[1], [0], [0], [1], [0, 0, 1, 1], [], []>} : vector<8x128xf32>, vector<128x128xf32>, vector<8x128xf32> -> vector<8x128xf32>
    %26 = arith.addf %23, %25 : vector<8x128xf32>
    %cst_18 = arith.constant 5.000000e-01 : f32
    %27 = vector.broadcast %cst_18 : f32 to vector<8x128xf32>
    %28 = arith.mulf %27, %26 : vector<8x128xf32>
    %29 = arith.select %12, %26, %28 : vector<8x128xi1>, vector<8x128xf32>
    %30 = math.tanh %29 : vector<8x128xf32>
    %cst_19 = arith.constant 5.000000e-01 : f32
    %31 = vector.broadcast %cst_19 : f32 to vector<8x128xf32>
    %32 = arith.mulf %31, %30 : vector<8x128xf32>
    %cst_20 = arith.constant 5.000000e-01 : f32
    %33 = vector.broadcast %cst_20 : f32 to vector<8x128xf32>
    %34 = arith.addf %32, %33 : vector<8x128xf32>
    %35 = arith.select %12, %30, %34 : vector<8x128xi1>, vector<8x128xf32>
    %c64_i32_21 = arith.constant 64 : i32
    %36 = tpu.dynamic_rotate %35 by %c64_i32_21 dim 1 : vector<8x128xf32>, i32 -> vector<8x128xf32>
    %37 = arith.mulf %35, %36 : vector<8x128xf32>
    %c32_i32 = arith.constant 32 : i32
    %38 = tpu.dynamic_rotate %37 by %c32_i32 dim 1 : vector<8x128xf32>, i32 -> vector<8x128xf32>
    %39 = arith.mulf %35, %19 : vector<8x128xf32>
    %40 = arith.addf %39, %38 : vector<8x128xf32>
    %cst_22 = arith.constant 0.000000e+00 : f32
    %41 = vector.broadcast %cst_22 : f32 to vector<8x128xf32>
    %42 = arith.select %17, %40, %41 : vector<8x128xi1>, vector<8x128xf32>
    %43 = math.tanh %42 : vector<8x128xf32>
    %c64_i32_23 = arith.constant 64 : i32
    %44 = tpu.dynamic_rotate %43 by %c64_i32_23 dim 1 : vector<8x128xf32>, i32 -> vector<8x128xf32>
    %45 = arith.mulf %35, %44 : vector<8x128xf32>
    %46 = arith.index_cast %21 : i32 to index
    %c0_24 = arith.constant 0 : index
    %47 = vector.load %arg9[%46, %c0_24] : memref<32x128xf32, #tpu.memory_space<vmem>>, vector<8x128xf32>
    tpu.vector_store %arg9[%46, %c0_24], %45 {strides = array<i32>} : memref<32x128xf32, #tpu.memory_space<vmem>>, vector<8x128xf32>,
    %c1_i32 = arith.constant 1 : i32
    %c8_i32_25 = arith.constant 8 : i32
    %48 = arith.muli %c1_i32, %c8_i32_25 : i32
    %49 = tpu.assume_multiple %48, 8 : i32
    %50 = arith.index_cast %49 : i32 to index
    %c0_26 = arith.constant 0 : index
    %51 = vector.load %arg8[%50, %c0_26] : memref<32x128xf32, #tpu.memory_space<vmem>>, vector<8x128xf32>
    %c0_27 = arith.constant 0 : index
    %c0_28 = arith.constant 0 : index
    %52 = vector.load %arg3[%c0_27, %c0_28] : memref<128x128xf32, #tpu.memory_space<vmem>>, vector<128x128xf32>
    %cst_29 = arith.constant dense<0.000000e+00> : vector<8x128xf32>
    %53 = tpu.matmul %45, %52, %cst_29 {dimension_numbers = #tpu.dot_dimension_numbers<[1], [0], [0], [1], [0, 0, 1, 1], [], []>} : vector<8x128xf32>, vector<128x128xf32>, vector<8x128xf32> -> vector<8x128xf32>
    %54 = arith.addf %51, %53 : vector<8x128xf32>
    %cst_30 = arith.constant 5.000000e-01 : f32
    %55 = vector.broadcast %cst_30 : f32 to vector<8x128xf32>
    %56 = arith.mulf %55, %54 : vector<8x128xf32>
    %57 = arith.select %12, %54, %56 : vector<8x128xi1>, vector<8x128xf32>
    %58 = math.tanh %57 : vector<8x128xf32>
    %cst_31 = arith.constant 5.000000e-01 : f32
    %59 = vector.broadcast %cst_31 : f32 to vector<8x128xf32>
    %60 = arith.mulf %59, %58 : vector<8x128xf32>
    %cst_32 = arith.constant 5.000000e-01 : f32
    %61 = vector.broadcast %cst_32 : f32 to vector<8x128xf32>
    %62 = arith.addf %60, %61 : vector<8x128xf32>
    %63 = arith.select %12, %58, %62 : vector<8x128xi1>, vector<8x128xf32>
    %c64_i32_33 = arith.constant 64 : i32
    %64 = tpu.dynamic_rotate %63 by %c64_i32_33 dim 1 : vector<8x128xf32>, i32 -> vector<8x128xf32>
    %65 = arith.mulf %63, %64 : vector<8x128xf32>
    %c32_i32_34 = arith.constant 32 : i32
    %66 = tpu.dynamic_rotate %65 by %c32_i32_34 dim 1 : vector<8x128xf32>, i32 -> vector<8x128xf32>
    %67 = arith.mulf %63, %42 : vector<8x128xf32>
    %68 = arith.addf %67, %66 : vector<8x128xf32>
    %cst_35 = arith.constant 0.000000e+00 : f32
    %69 = vector.broadcast %cst_35 : f32 to vector<8x128xf32>
    %70 = arith.select %17, %68, %69 : vector<8x128xi1>, vector<8x128xf32>
    %71 = math.tanh %70 : vector<8x128xf32>
    %c64_i32_36 = arith.constant 64 : i32
    %72 = tpu.dynamic_rotate %71 by %c64_i32_36 dim 1 : vector<8x128xf32>, i32 -> vector<8x128xf32>
    %73 = arith.mulf %63, %72 : vector<8x128xf32>
    %74 = arith.index_cast %49 : i32 to index
    %c0_37 = arith.constant 0 : index
    %75 = vector.load %arg9[%74, %c0_37] : memref<32x128xf32, #tpu.memory_space<vmem>>, vector<8x128xf32>
    tpu.vector_store %arg9[%74, %c0_37], %73 {strides = array<i32>} : memref<32x128xf32, #tpu.memory_space<vmem>>, vector<8x128xf32>,
    %c2_i32 = arith.constant 2 : i32
    %c8_i32_38 = arith.constant 8 : i32
    %76 = arith.muli %c2_i32, %c8_i32_38 : i32
    %77 = tpu.assume_multiple %76, 8 : i32
    %78 = arith.index_cast %77 : i32 to index
    %c0_39 = arith.constant 0 : index
    %79 = vector.load %arg8[%78, %c0_39] : memref<32x128xf32, #tpu.memory_space<vmem>>, vector<8x128xf32>
    %c0_40 = arith.constant 0 : index
    %c0_41 = arith.constant 0 : index
    %80 = vector.load %arg3[%c0_40, %c0_41] : memref<128x128xf32, #tpu.memory_space<vmem>>, vector<128x128xf32>
    %cst_42 = arith.constant dense<0.000000e+00> : vector<8x128xf32>
    %81 = tpu.matmul %73, %80, %cst_42 {dimension_numbers = #tpu.dot_dimension_numbers<[1], [0], [0], [1], [0, 0, 1, 1], [], []>} : vector<8x128xf32>, vector<128x128xf32>, vector<8x128xf32> -> vector<8x128xf32>
    %82 = arith.addf %79, %81 : vector<8x128xf32>
    %cst_43 = arith.constant 5.000000e-01 : f32
    %83 = vector.broadcast %cst_43 : f32 to vector<8x128xf32>
    %84 = arith.mulf %83, %82 : vector<8x128xf32>
    %85 = arith.select %12, %82, %84 : vector<8x128xi1>, vector<8x128xf32>
    %86 = math.tanh %85 : vector<8x128xf32>
    %cst_44 = arith.constant 5.000000e-01 : f32
    %87 = vector.broadcast %cst_44 : f32 to vector<8x128xf32>
    %88 = arith.mulf %87, %86 : vector<8x128xf32>
    %cst_45 = arith.constant 5.000000e-01 : f32
    %89 = vector.broadcast %cst_45 : f32 to vector<8x128xf32>
    %90 = arith.addf %88, %89 : vector<8x128xf32>
    %91 = arith.select %12, %86, %90 : vector<8x128xi1>, vector<8x128xf32>
    %c64_i32_46 = arith.constant 64 : i32
    %92 = tpu.dynamic_rotate %91 by %c64_i32_46 dim 1 : vector<8x128xf32>, i32 -> vector<8x128xf32>
    %93 = arith.mulf %91, %92 : vector<8x128xf32>
    %c32_i32_47 = arith.constant 32 : i32
    %94 = tpu.dynamic_rotate %93 by %c32_i32_47 dim 1 : vector<8x128xf32>, i32 -> vector<8x128xf32>
    %95 = arith.mulf %91, %70 : vector<8x128xf32>
    %96 = arith.addf %95, %94 : vector<8x128xf32>
    %cst_48 = arith.constant 0.000000e+00 : f32
    %97 = vector.broadcast %cst_48 : f32 to vector<8x128xf32>
    %98 = arith.select %17, %96, %97 : vector<8x128xi1>, vector<8x128xf32>
    %99 = math.tanh %98 : vector<8x128xf32>
    %c64_i32_49 = arith.constant 64 : i32
    %100 = tpu.dynamic_rotate %99 by %c64_i32_49 dim 1 : vector<8x128xf32>, i32 -> vector<8x128xf32>
    %101 = arith.mulf %91, %100 : vector<8x128xf32>
    %102 = arith.index_cast %77 : i32 to index
    %c0_50 = arith.constant 0 : index
    %103 = vector.load %arg9[%102, %c0_50] : memref<32x128xf32, #tpu.memory_space<vmem>>, vector<8x128xf32>
    tpu.vector_store %arg9[%102, %c0_50], %101 {strides = array<i32>} : memref<32x128xf32, #tpu.memory_space<vmem>>, vector<8x128xf32>,
    %c3_i32 = arith.constant 3 : i32
    %c8_i32_51 = arith.constant 8 : i32
    %104 = arith.muli %c3_i32, %c8_i32_51 : i32
    %105 = tpu.assume_multiple %104, 8 : i32
    %106 = arith.index_cast %105 : i32 to index
    %c0_52 = arith.constant 0 : index
    %107 = vector.load %arg8[%106, %c0_52] : memref<32x128xf32, #tpu.memory_space<vmem>>, vector<8x128xf32>
    %c0_53 = arith.constant 0 : index
    %c0_54 = arith.constant 0 : index
    %108 = vector.load %arg3[%c0_53, %c0_54] : memref<128x128xf32, #tpu.memory_space<vmem>>, vector<128x128xf32>
    %cst_55 = arith.constant dense<0.000000e+00> : vector<8x128xf32>
    %109 = tpu.matmul %101, %108, %cst_55 {dimension_numbers = #tpu.dot_dimension_numbers<[1], [0], [0], [1], [0, 0, 1, 1], [], []>} : vector<8x128xf32>, vector<128x128xf32>, vector<8x128xf32> -> vector<8x128xf32>
    %110 = arith.addf %107, %109 : vector<8x128xf32>
    %cst_56 = arith.constant 5.000000e-01 : f32
    %111 = vector.broadcast %cst_56 : f32 to vector<8x128xf32>
    %112 = arith.mulf %111, %110 : vector<8x128xf32>
    %113 = arith.select %12, %110, %112 : vector<8x128xi1>, vector<8x128xf32>
    %114 = math.tanh %113 : vector<8x128xf32>
    %cst_57 = arith.constant 5.000000e-01 : f32
    %115 = vector.broadcast %cst_57 : f32 to vector<8x128xf32>
    %116 = arith.mulf %115, %114 : vector<8x128xf32>
    %cst_58 = arith.constant 5.000000e-01 : f32
    %117 = vector.broadcast %cst_58 : f32 to vector<8x128xf32>
    %118 = arith.addf %116, %117 : vector<8x128xf32>
    %119 = arith.select %12, %114, %118 : vector<8x128xi1>, vector<8x128xf32>
    %c64_i32_59 = arith.constant 64 : i32
    %120 = tpu.dynamic_rotate %119 by %c64_i32_59 dim 1 : vector<8x128xf32>, i32 -> vector<8x128xf32>
    %121 = arith.mulf %119, %120 : vector<8x128xf32>
    %c32_i32_60 = arith.constant 32 : i32
    %122 = tpu.dynamic_rotate %121 by %c32_i32_60 dim 1 : vector<8x128xf32>, i32 -> vector<8x128xf32>
    %123 = arith.mulf %119, %98 : vector<8x128xf32>
    %124 = arith.addf %123, %122 : vector<8x128xf32>
    %cst_61 = arith.constant 0.000000e+00 : f32
    %125 = vector.broadcast %cst_61 : f32 to vector<8x128xf32>
    %126 = arith.select %17, %124, %125 : vector<8x128xi1>, vector<8x128xf32>
    %127 = math.tanh %126 : vector<8x128xf32>
    %c64_i32_62 = arith.constant 64 : i32
    %128 = tpu.dynamic_rotate %127 by %c64_i32_62 dim 1 : vector<8x128xf32>, i32 -> vector<8x128xf32>
    %129 = arith.mulf %119, %128 : vector<8x128xf32>
    %130 = arith.index_cast %105 : i32 to index
    %c0_63 = arith.constant 0 : index
    %131 = vector.load %arg9[%130, %c0_63] : memref<32x128xf32, #tpu.memory_space<vmem>>, vector<8x128xf32>
    tpu.vector_store %arg9[%130, %c0_63], %129 {strides = array<i32>} : memref<32x128xf32, #tpu.memory_space<vmem>>, vector<8x128xf32>,
    %c4_i32 = arith.constant 4 : i32
    %c0_64 = arith.constant 0 : index
    %c0_65 = arith.constant 0 : index
    %132 = vector.load %arg10[%c0_64, %c0_65] : memref<8x128xf32, #tpu.memory_space<vmem>>, vector<8x128xf32>
    tpu.vector_store %arg10[%c0_64, %c0_65], %129 {strides = array<i32>} : memref<8x128xf32, #tpu.memory_space<vmem>>, vector<8x128xf32>,
    %c0_66 = arith.constant 0 : index
    %c0_67 = arith.constant 0 : index
    %133 = vector.load %arg11[%c0_66, %c0_67] : memref<8x128xf32, #tpu.memory_space<vmem>>, vector<8x128xf32>
    tpu.vector_store %arg11[%c0_66, %c0_67], %126 {strides = array<i32>} : memref<8x128xf32, #tpu.memory_space<vmem>>, vector<8x128xf32>,
    %c0_68 = arith.constant 0 : index
    %c0_69 = arith.constant 0 : index
    %134 = vector.load %arg9[%c0_68, %c0_69] : memref<32x128xf32, #tpu.memory_space<vmem>>, vector<32x128xf32>
    %c0_70 = arith.constant 0 : index
    %c0_71 = arith.constant 0 : index
    %135 = vector.load %arg5[%c0_70, %c0_71] : memref<128x128xf32, #tpu.memory_space<vmem>>, vector<128x128xf32>
    %cst_72 = arith.constant dense<0.000000e+00> : vector<32x128xf32>
    %136 = tpu.matmul %134, %135, %cst_72 {dimension_numbers = #tpu.dot_dimension_numbers<[1], [0], [0], [1], [0, 0, 1, 1], [], []>} : vector<32x128xf32>, vector<128x128xf32>, vector<32x128xf32> -> vector<32x128xf32>
    %c0_73 = arith.constant 0 : index
    %c0_74 = arith.constant 0 : index
    %137 = vector.load %arg6[%c0_73, %c0_74] : memref<1x128xf32, #tpu.memory_space<vmem>>, vector<1x128xf32>
    %138 = vector.broadcast %137 : vector<1x128xf32> to vector<32x128xf32>
    %139 = arith.addf %136, %138 : vector<32x128xf32>
    %c0_75 = arith.constant 0 : index
    %c0_76 = arith.constant 0 : index
    %140 = vector.load %arg7[%c0_75, %c0_76] : memref<32x128xf32, #tpu.memory_space<vmem>>, vector<32x128xf32>
    tpu.vector_store %arg7[%c0_75, %c0_76], %139 {strides = array<i32>} : memref<32x128xf32, #tpu.memory_space<vmem>>, vector<32x128xf32>,
    return
  }
  func.func @transform_0(%arg0: i32) -> (i32, i32) {
    %c0_i32 = arith.constant 0 : i32
    %c0_i32_0 = arith.constant 0 : i32
    return %arg0, %c0_i32 : i32, i32
  }
  func.func @transform_1(%arg0: i32) -> (i32, i32) {
    %c0_i32 = arith.constant 0 : i32
    %c0_i32_0 = arith.constant 0 : i32
    %c0_i32_1 = arith.constant 0 : i32
    return %c0_i32, %c0_i32_0 : i32, i32
  }
  func.func @transform_2(%arg0: i32) -> (i32, i32) {
    %c0_i32 = arith.constant 0 : i32
    %c0_i32_0 = arith.constant 0 : i32
    %c0_i32_1 = arith.constant 0 : i32
    return %c0_i32, %c0_i32_0 : i32, i32
  }
  func.func @transform_3(%arg0: i32) -> (i32, i32) {
    %c0_i32 = arith.constant 0 : i32
    %c0_i32_0 = arith.constant 0 : i32
    %c0_i32_1 = arith.constant 0 : i32
    return %c0_i32, %c0_i32_0 : i32, i32
  }
  func.func @transform_4(%arg0: i32) -> (i32, i32) {
    %c0_i32 = arith.constant 0 : i32
    %c0_i32_0 = arith.constant 0 : i32
    %c0_i32_1 = arith.constant 0 : i32
    return %c0_i32, %c0_i32_0 : i32, i32
  }
  func.func @transform_5(%arg0: i32) -> (i32, i32) {
    %c0_i32 = arith.constant 0 : i32
    %c0_i32_0 = arith.constant 0 : i32
    %c0_i32_1 = arith.constant 0 : i32
    return %c0_i32, %c0_i32_0 : i32, i32
  }
  func.func @transform_6(%arg0: i32) -> (i32, i32) {
    %c0_i32 = arith.constant 0 : i32
    %c0_i32_0 = arith.constant 0 : i32
    return %arg0, %c0_i32 : i32, i32
  }
}

</mosaic_0001>

<bundles_post_ra>
// kernel: tpu_custom_call.1
= control target key start
LH: loop header
LB: loop body
LE: loop exit
PB: predicated region body
PF: predicated region fallthrough
CT: control target
= control target key end

     0   :  { %11 = vsyncpa [#allocation7], 0  ;;  %s2036_s0 = inlined_call_operand.vmem [shape: f32[64,16], index: 0, kind: input, shape index: {}]   ;;  %s2037_s1 = inlined_call_operand.vmem [shape: f32[16,128], index: 1, kind: input, shape index: {}]   ;;  %s2038_s2 = inlined_call_operand.hbm [shape: f32[128,128], index: 2, kind: input, shape index: {}]   ;;  %s2039_s3 = inlined_call_operand.vmem [shape: f32[1,128], index: 3, kind: input, shape index: {}]   ;;  %s2040_s4 = inlined_call_operand.hbm [shape: f32[128,128], index: 4, kind: input, shape index: {}]   ;;  %s2041_s5 = inlined_call_operand.vmem [shape: f32[1,128], index: 5, kind: input, shape index: {}]   ;;  %s2042_s6 = inlined_call_operand.hbm [shape: f32[64,128], index: 6, kind: output, shape index: {}]  }
   0x1   :  { %12 = vsyncpa [#allocation10], 0 }
   0x2   :  { %13 = vsyncpa [#allocation8], 0 }
   0x3   :  { %15 = vsyncpa [#allocation8 + $0x1], 0  ;;  %s1622_s21 = smov 0   ;;  %s1624_s22 = smov 0  }
   0x4   :  { %s1626_s23 = smov 0   ;;  %s1628_s24 = smov 0  }
   0x5 LB: > { %s1643_s25 = sadd.s32 4294967295, %s1573_s24   ;;  %s1062_s26 = sadd.s32 4294967294, %s1573_s24   ;;  %s1573_s24 = sphi %s1628_s24, %s2059_s24   ;;  %s1569_s23 = sphi %s1626_s23, %s2058_s23   ;;  %s1565_s22 = sphi %s1624_s22, %s2057_s22   ;;  %s1561_s21 = sphi %s1622_s21, %s2056_s21  }
   0x6   : > { %s1647_s27 = sadd.s32 1, %s1573_s24   ;;  %s159_s28 = sadd.s32 1, %s1569_s23 }
   0x7   : > { %s156_s29 = ssub.s32 %s1573_s24, %s1647_s27  ;;  %p169_p0 = scmp.ne.s32.totalorder %s1569_s23, %s1565_s22 }
   0x8   : > { %p157_p1 = scmp.eq.s32.totalorder %s156_s29, 0  ;;  %p170_p2 = scmp.eq.s32.totalorder %s1643_s25, 1 }
   0x9   : > { %p175_p3 = scmp.ne.s32.totalorder %s1565_s22, %s1561_s21  ;;  %p176_p4 = scmp.eq.s32.totalorder %s1062_s26, 1 }
   0xa   : > { %s1658_s30 = scalar_select %p157_p1, %s1569_s23, %s159_s28  }
   0xb   : > { %p1660_p5 = por %p170_p2, %p169_p0  ;;  %p1664_p6 = por %p176_p4, %p175_p3 }
   0xc   : > { %p1063_p7 = scmp.ge.s32.totalorder %s1573_s24, 1  ;;  %p183_p8 = scmp.lt.s32.totalorder %s1573_s24, 3 }
   0xd   : > { %s2045_s8 = scalar_select %p1664_p6, 1, 0 }
   0xe   : > { %p2043_p10 = scmp.eq.s32.totalorder %s1643_s25, 0  ;;  %p1672_p11 = pnand %p1063_p7, %p183_p8 }
   0xf   : > { %s1575_s10 = smov [#allocation6]   ;;  %s1576_s13 = smov [#allocation9]  }
  0x10   : > { %s198_s11 = sshll.u32 %s1575_s10, 4  ;;  %p1378_p12 = pneg %p1672_p11  ;;  %s199_s11 = int_to_ptr.vmem [resolvable:$true] %s198_s11 }
  0x11   : > { %s214_s14 = sshll.u32 %s1576_s13, 4  ;;  %s1464_s15 = scalar_lea.vmem %s199_s11, 2048  ;;  %s215_s14 = int_to_ptr.vmem [resolvable:$true] %s214_s14 }
  0x12   : > { %p1680_p13 = pnand %p2043_p10, %p1378_p12  ;;  %p1465_p1 = scmp.ne.s32.totalorder %s199_s11, %s1464_s15 }
  0x13   : > { %p1472_p4 = scmp.lt.s32.totalorder %s199_s11, %s199_s11  ;;  %p1473_p7 = scmp.lt.s32.totalorder %s1464_s15, %s1464_s15 }
  0x14   : > { %p1455_p0 = pneg %p1680_p13 }
  0x15   : > { %p1474_p8 = por %p1473_p7, %p1472_p4 }
  0x16   : > { %p1467_p2 = pnand %p1465_p1, %p1455_p0 }
  0x18   : > { %p1468_p3 = pneg %p1467_p2 }
  0x1a   : > { %p1475_p12 = pnand %p1474_p8, %p1468_p3 }
  0x1c   : > { %1478 = shalt.err (!%p1475_p12)
}
  0x1d   : > { %s1577_s16 = smov 128   ;;  %s1578_s17 = smov 8  }
  0x1e   : > { %1381 = dma.hbm_to_vmem [thread:$0]  (!%p1680_p13), %s2038_s2, 2048, %s199_s11, [#allocation7], %s1577_s16, %s1577_s16, %s1578_s17  }
  0x1f   : > { %s1490_s20 = scalar_lea.vmem %s215_s14, 2048  ;;  %p1498_p10 = scmp.lt.s32.totalorder %s215_s14, %s215_s14 }
  0x20   : > { %p1491_p9 = scmp.ne.s32.totalorder %s215_s14, %s1490_s20  ;;  %p1499_p6 = scmp.lt.s32.totalorder %s1490_s20, %s1490_s20 }
  0x22   : > { %p1493_p1 = pnand %p1491_p9, %p1455_p0  ;;  %p1500_p4 = por %p1499_p6, %p1498_p10 }
  0x24   : > { %p1494_p2 = pneg %p1493_p1 }
  0x26   : > { %p1501_p3 = pnand %p1500_p4, %p1494_p2 }
  0x28   : > { %1504 = shalt.err (!%p1501_p3)
}
  0x29   : > { %1384 = dma.hbm_to_vmem [thread:$0]  (!%p1680_p13), %s2040_s4, 2048, %s215_s14, [#allocation10], %s1577_s16, %s1577_s16, %s1578_s17  }
  0x2a   : > { %242 = sbr.rel (%p1672_p11) target bundleno = 2638 (0xa4e), region = 44  ;;  %p2048_p7 = scmp.eq.s32.totalorder (!%p1672_p11), %s1643_s25, 0 }
  0x2f   : > { %1548 = dma.done.wait (%p2048_p7), [#allocation7], 2048   ;;  %p2049_p9 = pmov %p2048_p7 }
  0x30   : > { %p2050_p0 = pmov %p2048_p7 }
  0x31   : > { %1550 = vsyncadd (%p2049_p9), [#allocation7], 4294965248 }
  0x32   : > { %1552 = dma.done.wait (%p2050_p0), [#allocation10], 2048   ;;  %p2051_p6 = pmov %p2050_p0 }
  0x33   : > { %s273_s29 = sand.u32 1, %s1565_s22   ;;  %s1071_s10 = sshll.u32 %s1643_s25, 2 }
  0x34   : > { %1554 = vsyncadd (%p2051_p6), [#allocation10], 4294965248  ;;  %s1070_s9 = sshll.u32 %s273_s29, 5  ;;  %p277_p10 = scmp.lt.s32.totalorder %s1071_s10, 7 }
  0x35   : > { %s1721_s15 = scalar_lea.vmem [#allocation11], %s1070_s9  ;;  %p2052_p11 = scmp.ne.s32.totalorder %s1643_s25, 0 }
  0x36   : > { %s2061_s10 = smov (!%p277_p10, %s1071_s10), 7 }
  0x37   : > { %s1072_s11 = sshll.u32 %s2061_s10, 3  ;;  %286 = sbr.rel (%p2052_p11) target bundleno = 62 (0x3e), region = 56 }
  0x38   : > { %s1719_s14 = scalar_lea.vmem %s2036_s0, %s1072_s11 }
  0x3c   : > { %v1579_v0 = vmov 0.0  }
  0x3d   : > { %287 = vst [vmem:[#allocation4] sm:$0xff] %v1579_v0  ;;  %288 = vst [vmem:[#allocation5] sm:$0xff] %v1579_v0 }
  0x3e PF: > { %v1725_v1 = vld [vmem:[#allocation6 + $0x78] sm:$0xff]  ;;  %v1580_v2 = vmov 0.0   ;;  %v1728_v3 = vld [vmem:[#allocation6 + $0x70] sm:$0xff]  ;;  %vm1581_vm0 = vmmov 0   ;;  %v1734_v4 = vld [vmem:[#allocation6 + $0x68] sm:$0xff]  ;;  %vm302_vm1 = vcmask 130048   ;;  %v404_v24 = vlaneseq }
  0x3f   : > { %1190 = vmatprep.subr.mxu1 %v1580_v2  ;;  %1222 = vmatprep.mubr.msk.f32.mxu1 %vm1581_vm0, %v1580_v2  ;;  %v294_v5 = vld [vmem:[%s2037_s1 + $0x8] sm:$0xff]  ;;  %v293_v6 = vld [vmem:[%s2037_s1] sm:$0xff]  ;;  %v1744_v7 = vld [vmem:[#allocation6 + $0x60] sm:$0xff]  ;;  %s1582_s28 = smov 64   ;;  %s1583_s10 = smov 32  }
  0x40   : > { %1191 = vmatpush3.msra.mxu1 %v1725_v1  ;;  %1180 = vmatprep.subr.mxu0 %v294_v5  ;;  %v289_v8 = vld [vmem:[%s1719_s14] sm:$0xff]  ;;  %v290_v9 = vld [vmem:[%s1719_s14 + $0x8] sm:$0xff]  ;;  %v1761_v12 = vld [vmem:[#allocation6 + $0x48] sm:$0xff]  ;;  %v1875_v27 = vand.u32 127, %v404_v24  ;;  %s1085_s12 = sshll.u32 %s1643_s25, 9  ;;  %s978_s13 = sshll.u32 %s1721_s15, 4  ;;  %s1990_s13 = int_to_ptr.vmem [resolvable:$true] %s978_s13 }
  0x41   : > { %1192 = vmatprep.subr.mxu1 %v1580_v2  ;;  %1181 = vmatpush3.msra.mxu0 %v294_v5  ;;  %v1750_v10 = vld [vmem:[#allocation6 + $0x58] sm:$0xff]  ;;  %v1755_v11 = vld [vmem:[#allocation6 + $0x50] sm:$0xff]  ;;  %v1767_v13 = vld [vmem:[#allocation6 + $0x40] sm:$0xff]  ;;  %s1988_s17 = scalar_lea.hbm %s2042_s6, %s1085_s12  ;;  %s1996_s18 = scalar_lea.sflag [#allocation8], %s273_s29 }
  0x42   : > { %1193 = vmatpush3.msra.mxu1 %v1728_v3  ;;  %1182 = vmatprep.subr.mxu0 %v293_v6  ;;  %v1773_v14 = vld [vmem:[#allocation6 + $0x38] sm:$0xff]  ;;  %v1779_v15 = vld [vmem:[#allocation6 + $0x30] sm:$0xff]  ;;  %v1785_v16 = vld [vmem:[#allocation6 + $0x28] sm:$0xff]  ;;  %vm406_vm2 = vcmp.ge.s32.totalorder %v1875_v27, 96  ;;  %vm407_vm3 = vcmp.ge.s32.totalorder %v1875_v27, 64  ;;  %vm408_vm4 = vcmp.lt.s32.totalorder %v1875_v27, 96 }
  0x43   : > { %1194 = vmatprep.subr.mxu1 %v1580_v2  ;;  %1183 = vmatpush3.msra.mxu0 %v293_v6  ;;  %v1791_v17 = vld [vmem:[#allocation6 + $0x20] sm:$0xff]  ;;  %v1797_v18 = vld [vmem:[#allocation6 + $0x18] sm:$0xff]  ;;  %v1803_v19 = vld [vmem:[#allocation6 + $0x10] sm:$0xff]  ;;  %s1505_s25 = scalar_lea.vmem %s1990_s13, 512  ;;  %s1584_s19 = smov [#allocation11]  }
  0x44   : > { %1195 = vmatpush3.msra.mxu1 %v1734_v4  ;;  %1184 = vmatprep.mubr.msk.f32.mxu0 %vm302_vm1, %v289_v8  ;;  %v1809_v20 = vld [vmem:[#allocation6 + $0x8] sm:$0xff]  ;;  %v1815_v21 = vld [vmem:[#allocation6] sm:$0xff]  ;;  %v410_v22 = vld [vmem:[#allocation4] sm:$0xff]  ;;  %p1506_p13 = scmp.ne.s32.totalorder %s1990_s13, %s1505_s25  ;;  %s1509_s20 = sshll.u32 %s1584_s19, 4  ;;  %s1510_s20 = int_to_ptr.vmem [resolvable:$false] %s1509_s20 }
  0x45   : > { %1196 = vmatprep.subr.mxu1 %v1580_v2  ;;  %1185 = vmatmul.mubr.msk.f32.vlgmr.msra.gmra.mxu0 %vm302_vm1, %v290_v9  ;;  %v1873_v25 = vld [vmem:[%s2039_s3] ss:$0 sm:$0xff]  ;;  %v291_v40 = vld [vmem:[%s1719_s14 + $0x10] sm:$0xff]  ;;  %v292_v41 = vld [vmem:[%s1719_s14 + $0x18] sm:$0xff]  ;;  %s1511_s26 = scalar_lea.vmem %s1510_s20, 1024  ;;  %p1512_p1 = scmp.lt.s32.totalorder %s1990_s13, %s1510_s20 }
  0x46   : > { %1197 = vmatpush3.msra.mxu1 %v1744_v7  ;;  %1225 = vmatprep.subr.mxu0 %v1580_v2  ;;  %v411_v42 = vld [vmem:[#allocation5] sm:$0xff]  ;;  %vm1893_vm5 = vmand %vm407_vm3, %vm408_vm4  ;;  %v866_v9 = vld [vmem:[#allocation9 + $0x70] sm:$0xff]  ;;  %p1507_p8 = pnand %p1506_p13, %p1660_p5  ;;  %p1513_p2 = scmp.lt.s32.totalorder %s1511_s26, %s1505_s25 }
  0x47   : > { %1198 = vmatprep.subr.mxu1 %v1580_v2  ;;  %1226 = vmatpush3.msra.mxu0 %v1725_v1  ;;  %v867_v5 = vld [vmem:[#allocation9 + $0x78] sm:$0xff] }
  0x48   : > { %1199 = vmatpush3.msra.mxu1 %v1750_v10  ;;  %1227 = vmatprep.subr.mxu0 %v1580_v2  ;;  %p1508_p12 = pneg %p1507_p8  ;;  %p1514_p4 = por %p1513_p2, %p1512_p1 }
  0x49   : > { %1200 = vmatprep.subr.mxu1 %v1580_v2  ;;  %1228 = vmatpush3.msra.mxu0 %v1728_v3 }
  0x4a   : > { %1201 = vmatpush3.msra.mxu1 %v1755_v11  ;;  %1229 = vmatprep.subr.mxu0 %v1580_v2  ;;  %p1515_p3 = pnand %p1514_p4, %p1508_p12 }
  0x4b   : > { %1202 = vmatprep.subr.mxu1 %v1580_v2  ;;  %1230 = vmatpush3.msra.mxu0 %v1734_v4 }
  0x4c   : > { %1203 = vmatpush3.msra.mxu1 %v1761_v12  ;;  %1231 = vmatprep.subr.mxu0 %v1580_v2 }
  0x4d   : > { %1204 = vmatprep.subr.mxu1 %v1580_v2  ;;  %1232 = vmatpush3.msra.mxu0 %v1744_v7 }
  0x4e   : > { %1205 = vmatpush3.msra.mxu1 %v1767_v13  ;;  %1233 = vmatprep.subr.mxu0 %v1580_v2 }
  0x4f   : > { %1206 = vmatprep.subr.mxu1 %v1580_v2  ;;  %1234 = vmatpush3.msra.mxu0 %v1750_v10 }
  0x50   : > { %1207 = vmatpush3.msra.mxu1 %v1773_v14  ;;  %1235 = vmatprep.subr.mxu0 %v1580_v2 }
  0x51   : > { %1208 = vmatprep.subr.mxu1 %v1580_v2  ;;  %1236 = vmatpush3.msra.mxu0 %v1755_v11 }
  0x52   : > { %1209 = vmatpush3.msra.mxu1 %v1779_v15  ;;  %1237 = vmatprep.subr.mxu0 %v1580_v2 }
  0x53   : > { %1210 = vmatprep.subr.mxu1 %v1580_v2  ;;  %1238 = vmatpush3.msra.mxu0 %v1761_v12 }
  0x54   : > { %1211 = vmatpush3.msra.mxu1 %v1785_v16  ;;  %1239 = vmatprep.subr.mxu0 %v1580_v2 }
  0x55   : > { %1212 = vmatprep.subr.mxu1 %v1580_v2  ;;  %1240 = vmatpush3.msra.mxu0 %v1767_v13 }
  0x56   : > { %1213 = vmatpush3.msra.mxu1 %v1791_v17  ;;  %1241 = vmatprep.subr.mxu0 %v1580_v2 }
  0x57   : > { %1214 = vmatprep.subr.mxu1 %v1580_v2  ;;  %1242 = vmatpush3.msra.mxu0 %v1773_v14 }
  0x58   : > { %1215 = vmatpush3.msra.mxu1 %v1797_v18  ;;  %1243 = vmatprep.subr.mxu0 %v1580_v2 }
  0x59   : > { %1216 = vmatprep.subr.mxu1 %v1580_v2  ;;  %1244 = vmatpush3.msra.mxu0 %v1779_v15 }
  0x5a   : > { %1217 = vmatpush3.msra.mxu1 %v1803_v19  ;;  %1245 = vmatprep.subr.mxu0 %v1580_v2 }
  0x5b   : > { %1218 = vmatprep.subr.mxu1 %v1580_v2  ;;  %1246 = vmatpush3.msra.mxu0 %v1785_v16 }
  0x5c   : > { %1219 = vmatpush3.msra.mxu1 %v1809_v20  ;;  %1247 = vmatprep.subr.mxu0 %v1580_v2 }
  0x5d   : > { %1220 = vmatprep.subr.mxu1 %v1580_v2  ;;  %1248 = vmatpush3.msra.mxu0 %v1791_v17 }
  0x5e   : > { %1221 = vmatpush3.msra.mxu1 %v1815_v21  ;;  %1249 = vmatprep.subr.mxu0 %v1580_v2 }
  0x5f   : > { %1223 = vmatmul.mubr.f32.vlgmr.msra.gmra.mxu1 %v410_v22  ;;  %1260 = vmatprep.subr.mxu1 %v1580_v2  ;;  %v853_v22 = vld [vmem:[#allocation9 + $0x8] sm:$0xff] }
  0x60   : > { %1250 = vmatpush3.msra.mxu0 %v1797_v18  ;;  %1261 = vmatpush3.msra.mxu1 %v1725_v1 }
  0x61   : > { %1251 = vmatprep.subr.mxu0 %v1580_v2  ;;  %1262 = vmatprep.subr.mxu1 %v1580_v2 }
  0x62   : > { %1252 = vmatpush3.msra.mxu0 %v1803_v19  ;;  %1263 = vmatpush3.msra.mxu1 %v1728_v3 }
  0x63   : > { %1253 = vmatprep.subr.mxu0 %v1580_v2  ;;  %1264 = vmatprep.subr.mxu1 %v1580_v2 }
  0x64   : > { %1254 = vmatpush3.msra.mxu0 %v1809_v20  ;;  %1265 = vmatpush3.msra.mxu1 %v1734_v4 }
  0x65   : > { %1255 = vmatprep.subr.mxu0 %v1580_v2  ;;  %1266 = vmatprep.subr.mxu1 %v1580_v2 }
  0x66   : > { %1256 = vmatpush3.msra.mxu0 %v1815_v21  ;;  %1267 = vmatpush3.msra.mxu1 %v1744_v7 }
  0x67   : > { %1268 = vmatprep.subr.mxu1 %v1580_v2  ;;  %1292 = vmatprep.mubr.msk.f32.mxu1 %vm1581_vm0, %v1580_v2 }
  0x68   : > { %1269 = vmatpush3.msra.mxu1 %v1750_v10  ;;  %1295 = vmatprep.subr.mxu0 %v1580_v2 }
  0x69   : > { %1270 = vmatprep.subr.mxu1 %v1580_v2  ;;  %1187 = vmatprep.mubr.msk.f32.mxu0 %vm302_vm1, %v291_v40 }
  0x6a   : > { %1271 = vmatpush3.msra.mxu1 %v1755_v11  ;;  %1188 = vmatmul.mubr.msk.f32.gmra.mxu0 %vm302_vm1, %v292_v41 }
  0x6b   : > { %1272 = vmatprep.subr.mxu1 %v1580_v2  ;;  %1257 = vmatprep.mubr.msk.f32.mxu0 %vm1581_vm0, %v1580_v2 }
  0x6c   : > { %1273 = vmatpush3.msra.mxu1 %v1761_v12 }
  0x6d   : > { %1274 = vmatprep.subr.mxu1 %v1580_v2 }
  0x6e   : > { %1275 = vmatpush3.msra.mxu1 %v1767_v13 }
  0x6f   : > { %1276 = vmatprep.subr.mxu1 %v1580_v2 }
  0x70   : > { %1277 = vmatpush3.msra.mxu1 %v1773_v14 }
  0x71   : > { %1278 = vmatprep.subr.mxu1 %v1580_v2 }
  0x72   : > { %1279 = vmatpush3.msra.mxu1 %v1779_v15 }
  0x73   : > { %1280 = vmatprep.subr.mxu1 %v1580_v2 }
  0x74   : > { %1281 = vmatpush3.msra.mxu1 %v1785_v16 }
  0x75   : > { %1282 = vmatprep.subr.mxu1 %v1580_v2 }
  0x76   : > { %1283 = vmatpush3.msra.mxu1 %v1791_v17 }
  0x77   : > { %1284 = vmatprep.subr.mxu1 %v1580_v2 }
  0x78   : > { %1285 = vmatpush3.msra.mxu1 %v1797_v18 }
  0x79   : > { %1286 = vmatprep.subr.mxu1 %v1580_v2 }
  0x7a   : > { %1287 = vmatpush3.msra.mxu1 %v1803_v19 }
  0x7b   : > { %1288 = vmatprep.subr.mxu1 %v1580_v2 }
  0x7c   : > { %1289 = vmatpush3.msra.mxu1 %v1809_v20 }
  0x7d   : > { %1290 = vmatprep.subr.mxu1 %v1580_v2 }
  0x7e   : > { %1291 = vmatpush3.msra.mxu1 %v1815_v21 }
  0x7f   : > { %1330 = vmatprep.subr.mxu1 %v867_v5 }
 0x105   : > { %v1868_v23 = vpop.f32.mrf.mxu0 }
 0x106   : > { %v387_v53 = vadd.f32 %v1868_v23, %v1873_v25  ;;  %v852_v23 = vld [vmem:[#allocation9] sm:$0xff] }
 0x107   : > { %v381_v26 = vpop.f32.mrf.mxu0 }
 0x108   : > { %v382_v28 = vadd.f32 %v1873_v25, %v381_v26 }
 0x11f   : > { %v495_v29 = vpop.f32.mrf.mxu1 }
 0x120   : > { %v499_v30 = vadd.f32 %v495_v29, %v382_v28 }
 0x121   : > { %v1224_v31 = vpop.f32.mrf.mxu1 }
 0x122   : > { %v500_v32 = vmul.f32 0.5, %v499_v30 }
 0x124   : > { %v501_v33 = vsel %vm406_vm2, %v499_v30, %v500_v32 }
 0x125   : > { %1437 = vtanh.f32 %v501_v33 }
 0x12a   : > { %v1936_v51 = vpop.f32.mrf.mxu0 }
 0x12c   : > { %v1938_v52 = vpop.f32.mrf.mxu0 }
 0x12d   : > { %v392_v24 = vadd.f32 %v1873_v25, %v1938_v52  ;;  %v397_v52 = vadd.f32 %v1936_v51, %v1873_v25 }
 0x132   : > { %v1438_v34 = vpop.eup %1437 }
 0x133   : > { %v503_v35 = vmul.f32 0.5, %v1438_v34 }
 0x135   : > { %v504_v36 = vadd.f32 0.5, %v503_v35 }
 0x137   : > { %v505_v37 = vsel %vm406_vm2, %v1438_v34, %v504_v36  ;;  %v1079_v36 = vld [vmem:[%s2041_s5] ss:$0 sm:$0xff] }
 0x138   : > { %506 = vrot.lane.b32.xlu0 %v505_v37, %s1582_s28  ;;  %v511_v43 = vmul.f32 %v505_v37, %v411_v42 }
 0x1aa   : > { %v507_v38 = vpop.permute.xlu0 %506 }
 0x1ab   : > { %v508_v39 = vmul.f32 %v507_v38, %v505_v37 }
 0x1ad   : > { %509 = vrot.lane.b32.xlu0 %v508_v39, %s1583_s10 }
 0x21f   : > { %v510_v45 = vpop.permute.xlu0 %509 }
 0x220   : > { %v512_v46 = vadd.f32 %v511_v43, %v510_v45 }
 0x222   : > { %v513_v47 = vsel %vm1893_vm5, %v512_v46, 0.0 }
 0x223   : > { %1439 = vtanh.f32 %v513_v47 }
 0x230   : > { %v1440_v48 = vpop.eup %1439 }
 0x231   : > { %515 = vrot.lane.b32.xlu1 %v1440_v48, %s1582_s28 }
 0x2a3   : > { %v516_v49 = vpop.permute.xlu1 %515 }
 0x2a4   : > { %v1900_v50 = vmul.f32 %v516_v49, %v505_v37 }
 0x2a6   : > { %1258 = vmatmul.mubr.f32.vlgmr.msra.gmra.mxu0 %v1900_v50 }
 0x2a7   : > { %1296 = vmatpush3.msra.mxu0 %v1725_v1  ;;  %1327 = vmatprep.mubr.msk.f32.mxu0 %vm1581_vm0, %v1580_v2 }
 0x2a8   : > { %1297 = vmatprep.subr.mxu0 %v1580_v2 }
 0x2a9   : > { %1298 = vmatpush3.msra.mxu0 %v1728_v3 }
 0x2aa   : > { %1299 = vmatprep.subr.mxu0 %v1580_v2 }
 0x2ab   : > { %1300 = vmatpush3.msra.mxu0 %v1734_v4 }
 0x2ac   : > { %1301 = vmatprep.subr.mxu0 %v1580_v2 }
 0x2ad   : > { %1302 = vmatpush3.msra.mxu0 %v1744_v7 }
 0x2ae   : > { %1303 = vmatprep.subr.mxu0 %v1580_v2 }
 0x2af   : > { %1304 = vmatpush3.msra.mxu0 %v1750_v10  ;;  %v865_v10 = vld [vmem:[#allocation9 + $0x68] sm:$0xff] }
 0x2b0   : > { %1305 = vmatprep.subr.mxu0 %v1580_v2 }
 0x2b1   : > { %1306 = vmatpush3.msra.mxu0 %v1755_v11  ;;  %v864_v11 = vld [vmem:[#allocation9 + $0x60] sm:$0xff] }
 0x2b2   : > { %1307 = vmatprep.subr.mxu0 %v1580_v2 }
 0x2b3   : > { %1308 = vmatpush3.msra.mxu0 %v1761_v12  ;;  %v863_v12 = vld [vmem:[#allocation9 + $0x58] sm:$0xff] }
 0x2b4   : > { %1309 = vmatprep.subr.mxu0 %v1580_v2 }
 0x2b5   : > { %1310 = vmatpush3.msra.mxu0 %v1767_v13  ;;  %v862_v13 = vld [vmem:[#allocation9 + $0x50] sm:$0xff] }
 0x2b6   : > { %1311 = vmatprep.subr.mxu0 %v1580_v2 }
 0x2b7   : > { %1312 = vmatpush3.msra.mxu0 %v1773_v14  ;;  %v861_v14 = vld [vmem:[#allocation9 + $0x48] sm:$0xff] }
 0x2b8   : > { %1313 = vmatprep.subr.mxu0 %v1580_v2 }
 0x2b9   : > { %1314 = vmatpush3.msra.mxu0 %v1779_v15  ;;  %v860_v15 = vld [vmem:[#allocation9 + $0x40] sm:$0xff] }
 0x2ba   : > { %1315 = vmatprep.subr.mxu0 %v1580_v2 }
 0x2bb   : > { %1316 = vmatpush3.msra.mxu0 %v1785_v16  ;;  %v859_v16 = vld [vmem:[#allocation9 + $0x38] sm:$0xff] }
 0x2bc   : > { %1317 = vmatprep.subr.mxu0 %v1580_v2 }
 0x2bd   : > { %1318 = vmatpush3.msra.mxu0 %v1791_v17  ;;  %v858_v17 = vld [vmem:[#allocation9 + $0x30] sm:$0xff] }
 0x2be   : > { %1319 = vmatprep.subr.mxu0 %v1580_v2 }
 0x2bf   : > { %1320 = vmatpush3.msra.mxu0 %v1797_v18  ;;  %v857_v18 = vld [vmem:[#allocation9 + $0x28] sm:$0xff] }
 0x2c0   : > { %1321 = vmatprep.subr.mxu0 %v1580_v2 }
 0x2c1   : > { %1322 = vmatpush3.msra.mxu0 %v1803_v19  ;;  %v856_v19 = vld [vmem:[#allocation9 + $0x20] sm:$0xff] }
 0x2c2   : > { %1323 = vmatprep.subr.mxu0 %v1580_v2 }
 0x2c3   : > { %1324 = vmatpush3.msra.mxu0 %v1809_v20  ;;  %v855_v20 = vld [vmem:[#allocation9 + $0x18] sm:$0xff] }
 0x2c4   : > { %1325 = vmatprep.subr.mxu0 %v1580_v2 }
 0x2c5   : > { %1326 = vmatpush3.msra.mxu0 %v1815_v21  ;;  %v854_v21 = vld [vmem:[#allocation9 + $0x10] sm:$0xff] }
 0x366   : > { %v603_v54 = vpop.f32.mrf.mxu0 }
 0x367   : > { %v607_v55 = vadd.f32 %v603_v54, %v387_v53 }
 0x368   : > { %v1259_v56 = vpop.f32.mrf.mxu0 }
 0x369   : > { %v608_v57 = vmul.f32 0.5, %v607_v55 }
 0x36b   : > { %v609_v58 = vsel %vm406_vm2, %v607_v55, %v608_v57 }
 0x36c   : > { %1441 = vtanh.f32 %v609_v58 }
 0x379   : > { %v1442_v59 = vpop.eup %1441 }
 0x37a   : > { %v611_v60 = vmul.f32 0.5, %v1442_v59 }
 0x37c   : > { %v612_v61 = vadd.f32 0.5, %v611_v60 }
 0x37e   : > { %v613_v62 = vsel %vm406_vm2, %v1442_v59, %v612_v61 }
 0x37f   : > { %614 = vrot.lane.b32.xlu1 %v613_v62, %s1582_s28  ;;  %v619_v1 = vmul.f32 %v613_v62, %v513_v47 }
 0x3f1   : > { %v615_v63 = vpop.permute.xlu1 %614 }
 0x3f2   : > { %v616_v0 = vmul.f32 %v615_v63, %v613_v62 }
 0x3f4   : > { %617 = vrot.lane.b32.xlu0 %v616_v0, %s1583_s10 }
 0x466   : > { %v618_v2 = vpop.permute.xlu0 %617 }
 0x467   : > { %v620_v3 = vadd.f32 %v619_v1, %v618_v2 }
 0x469   : > { %v1950_v4 = vsel %vm1893_vm5, %v620_v3, 0.0 }
 0x46a   : > { %1443 = vtanh.f32 %v1950_v4 }
 0x477   : > { %v1444_v6 = vpop.eup %1443 }
 0x478   : > { %623 = vrot.lane.b32.xlu1 %v1444_v6, %s1582_s28 }
 0x4ea   : > { %v624_v7 = vpop.permute.xlu1 %623 }
 0x4eb   : > { %v625_v8 = vmul.f32 %v624_v7, %v613_v62 }
 0x4ed   : > { %1293 = vmatmul.mubr.f32.vlgmr.msra.gmra.mxu1 %v625_v8 }
 0x4ee   : > { %1331 = vmatpush3.msra.mxu1 %v867_v5  ;;  %1362 = vmatprep.mubr.f32.mxu1 %v1900_v50 }
 0x4ef   : > { %1332 = vmatprep.subr.mxu1 %v866_v9 }
 0x4f0   : > { %1333 = vmatpush3.msra.mxu1 %v866_v9 }
 0x4f1   : > { %1334 = vmatprep.subr.mxu1 %v865_v10 }
 0x4f2   : > { %1335 = vmatpush3.msra.mxu1 %v865_v10 }
 0x4f3   : > { %1336 = vmatprep.subr.mxu1 %v864_v11 }
 0x4f4   : > { %1337 = vmatpush3.msra.mxu1 %v864_v11 }
 0x4f5   : > { %1338 = vmatprep.subr.mxu1 %v863_v12 }
 0x4f6   : > { %1339 = vmatpush3.msra.mxu1 %v863_v12 }
 0x4f7   : > { %1340 = vmatprep.subr.mxu1 %v862_v13 }
 0x4f8   : > { %1341 = vmatpush3.msra.mxu1 %v862_v13 }
 0x4f9   : > { %1342 = vmatprep.subr.mxu1 %v861_v14 }
 0x4fa   : > { %1343 = vmatpush3.msra.mxu1 %v861_v14 }
 0x4fb   : > { %1344 = vmatprep.subr.mxu1 %v860_v15 }
 0x4fc   : > { %1345 = vmatpush3.msra.mxu1 %v860_v15 }
 0x4fd   : > { %1346 = vmatprep.subr.mxu1 %v859_v16 }
 0x4fe   : > { %1347 = vmatpush3.msra.mxu1 %v859_v16 }
 0x4ff   : > { %1348 = vmatprep.subr.mxu1 %v858_v17 }
 0x500   : > { %1349 = vmatpush3.msra.mxu1 %v858_v17 }
 0x501   : > { %1350 = vmatprep.subr.mxu1 %v857_v18 }
 0x502   : > { %1351 = vmatpush3.msra.mxu1 %v857_v18 }
 0x503   : > { %1352 = vmatprep.subr.mxu1 %v856_v19 }
 0x504   : > { %1353 = vmatpush3.msra.mxu1 %v856_v19 }
 0x505   : > { %1354 = vmatprep.subr.mxu1 %v855_v20 }
 0x506   : > { %1355 = vmatpush3.msra.mxu1 %v855_v20 }
 0x507   : > { %1356 = vmatprep.subr.mxu1 %v854_v21 }
 0x508   : > { %1357 = vmatpush3.msra.mxu1 %v854_v21 }
 0x509   : > { %1358 = vmatprep.subr.mxu1 %v853_v22 }
 0x50a   : > { %1359 = vmatpush3.msra.mxu1 %v853_v22 }
 0x50b   : > { %1360 = vmatprep.subr.mxu1 %v852_v23 }
 0x50c   : > { %1361 = vmatpush3.msra.mxu1 %v852_v23 }
 0x50d   : > { %1363 = vmatmul.mubr.f32.vlgmr.msra.gmra.mxu1 %v625_v8 }
 0x5ad   : > { %v712_v26 = vpop.f32.mrf.mxu1 }
 0x5ae   : > { %v716_v28 = vadd.f32 %v712_v26, %v392_v24 }
 0x5af   : > { %v1294_v29 = vpop.f32.mrf.mxu1 }
 0x5b0   : > { %v717_v30 = vmul.f32 0.5, %v716_v28 }
 0x5b2   : > { %v718_v31 = vsel %vm406_vm2, %v716_v28, %v717_v30 }
 0x5b3   : > { %1445 = vtanh.f32 %v718_v31 }
 0x5c0   : > { %v1446_v32 = vpop.eup %1445 }
 0x5c1   : > { %v720_v33 = vmul.f32 0.5, %v1446_v32 }
 0x5c3   : > { %v721_v34 = vadd.f32 0.5, %v720_v33 }
 0x5c5   : > { %v722_v35 = vsel %vm406_vm2, %v1446_v32, %v721_v34 }
 0x5c6   : > { %723 = vrot.lane.b32.xlu0 %v722_v35, %s1582_s28  ;;  %v728_v43 = vmul.f32 %v722_v35, %v1950_v4 }
 0x5cd   : > { %v1364_v37 = vpop.f32.mrf.mxu1 }
 0x5ce   : > { %v947_v38 = vadd.f32 %v1364_v37, %v1079_v36 }
 0x5cf   : > { %v941_v39 = vpop.f32.mrf.mxu1 }
 0x5d0   : > { %961 = vst [vmem:[%s1721_s15 + $0x8] sm:$0xff] %v947_v38  ;;  %v942_v40 = vadd.f32 %v1079_v36, %v941_v39 }
 0x5d2   : > { %960 = vst [vmem:[%s1721_s15] sm:$0xff] %v942_v40 }
 0x638   : > { %v724_v41 = vpop.permute.xlu0 %723 }
 0x639   : > { %v725_v42 = vmul.f32 %v724_v41, %v722_v35 }
 0x63b   : > { %726 = vrot.lane.b32.xlu1 %v725_v42, %s1583_s10 }
 0x6ad   : > { %v727_v45 = vpop.permute.xlu1 %726 }
 0x6ae   : > { %v729_v46 = vadd.f32 %v728_v43, %v727_v45 }
 0x6b0   : > { %v730_v47 = vsel %vm1893_vm5, %v729_v46, 0.0 }
 0x6b1   : > { %1447 = vtanh.f32 %v730_v47 }
 0x6be   : > { %v1448_v48 = vpop.eup %1447 }
 0x6bf   : > { %732 = vrot.lane.b32.xlu0 %v1448_v48, %s1582_s28 }
 0x731   : > { %v733_v49 = vpop.permute.xlu0 %732 }
 0x732   : > { %v734_v50 = vmul.f32 %v733_v49, %v722_v35 }
 0x734   : > { %1328 = vmatmul.mubr.f32.vlgmr.msra.gmra.mxu0 %v734_v50  ;;  %1365 = vmatprep.mubr.f32.mxu1 %v734_v50 }
 0x7f4   : > { %v821_v53 = vpop.f32.mrf.mxu0 }
 0x7f5   : > { %v825_v54 = vadd.f32 %v821_v53, %v397_v52 }
 0x7f6   : > { %v1329_v55 = vpop.f32.mrf.mxu0 }
 0x7f7   : > { %v826_v56 = vmul.f32 0.5, %v825_v54 }
 0x7f9   : > { %v827_v57 = vsel %vm406_vm2, %v825_v54, %v826_v56 }
 0x7fa   : > { %1449 = vtanh.f32 %v827_v57 }
 0x807   : > { %v1450_v58 = vpop.eup %1449 }
 0x808   : > { %v829_v59 = vmul.f32 0.5, %v1450_v58 }
 0x80a   : > { %v830_v60 = vadd.f32 0.5, %v829_v59 }
 0x80c   : > { %v831_v61 = vsel %vm406_vm2, %v1450_v58, %v830_v60 }
 0x80d   : > { %832 = vrot.lane.b32.xlu1 %v831_v61, %s1582_s28  ;;  %v837_v51 = vmul.f32 %v831_v61, %v730_v47 }
 0x87f   : > { %v833_v62 = vpop.permute.xlu1 %832 }
 0x880   : > { %v834_v25 = vmul.f32 %v833_v62, %v831_v61 }
 0x882   : > { %835 = vrot.lane.b32.xlu0 %v834_v25, %s1583_s10 }
 0x8f4   : > { %v836_v63 = vpop.permute.xlu0 %835 }
 0x8f5   : > { %v838_v0 = vadd.f32 %v837_v51, %v836_v63 }
 0x8f7   : > { %v839_v1 = vsel %vm1893_vm5, %v838_v0, 0.0 }
 0x8f8   : > { %1451 = vtanh.f32 %v839_v1  ;;  %847 = vst [vmem:[#allocation5] sm:$0xff] %v839_v1 }
 0x905   : > { %v1452_v27 = vpop.eup %1451 }
 0x906   : > { %841 = vrot.lane.b32.xlu1 %v1452_v27, %s1582_s28 }
 0x978   : > { %v842_v2 = vpop.permute.xlu1 %841 }
 0x979   : > { %v843_v3 = vmul.f32 %v842_v2, %v831_v61 }
 0x97b   : > { %846 = vst [vmem:[#allocation4] sm:$0xff] %v843_v3  ;;  %1366 = vmatmul.mubr.f32.gmra.mxu1 %v843_v3 }
 0xa3b   : > { %v1367_v4 = vpop.f32.mrf.mxu1 }
 0xa3c   : > { %v957_v5 = vadd.f32 %v1367_v4, %v1079_v36 }
 0xa3d   : > { %v951_v6 = vpop.f32.mrf.mxu1 }
 0xa3e   : > { %963 = vst [vmem:[%s1721_s15 + $0x18] sm:$0xff] %v957_v5  ;;  %v952_v44 = vadd.f32 %v1079_v36, %v951_v6 }
 0xa40   : > { %962 = vst [vmem:[%s1721_s15 + $0x10] sm:$0xff] %v952_v44 }
 0xa41   : > { %1518 = shalt.err (!%p1515_p3)
}
 0xa42   : > { %s1519_s29 = scalar_lea.hbm %s1988_s17, 512  ;;  %s1523_s10 = scalar_lea.hbm %s2042_s6, 1024 }
 0xa43   : > { %p1520_p7 = scmp.ne.s32.totalorder %s1988_s17, %s1519_s29  ;;  %p1524_p6 = scmp.lt.s32.totalorder %s1988_s17, %s2042_s6 }
 0xa44   : > { %p1525_p10 = scmp.lt.s32.totalorder %s1523_s10, %s1519_s29 }
 0xa45   : > { %p1521_p9 = pnand %p1520_p7, %p1660_p5 }
 0xa46   : > { %p1526_p11 = por %p1525_p10, %p1524_p6 }
 0xa47   : > { %p1522_p0 = pneg %p1521_p9 }
 0xa49   : > { %p1527_p13 = pnand %p1526_p11, %p1522_p0 }
 0xa4b   : > { %1530 = shalt.err (!%p1527_p13)
}
 0xa4c   : > { %s1585_s12 = smov 128   ;;  %s1586_s14 = smov 8  }
 0xa4d   : > { %1376 = dma.vmem_to_hbm [thread:$0]  (%p1660_p5), %s1990_s13, 512, %s1988_s17, %s1996_s18, %s1585_s12, %s1585_s12, %s1586_s14  }
 0xa4e PF: > { %p1393_p8 = scmp.ge.s32.totalorder %s1573_s24, 2  ;;  %s993_s16 = sand.u32 1, %s1561_s21  }
 0xa4f   : > { %p2055_p12 = scmp.ne.s32.totalorder %s2045_s8, 0  ;;  %s994_s25 = scalar_lea.sflag [#allocation8], %s993_s16 }
 0xa51   : > { %p1386_p1 = pnand %p1393_p8, %p2055_p12 }
 0xa53   : > { %p1387_p2 = pneg %p1386_p1 }
 0xa55   : > { %1556 = dma.done.wait (%p1387_p2), %s994_s25, 512  }
 0xa56   : > { %1558 = vsyncadd (%p1387_p2), %s994_s25, 4294966784  ;;  %p18_p4 = scmp.ge.s32.totalorder %s1647_s27, 4   ;;  %s2056_s21 = smov %s1565_s22 }
 0xa57   : > { %s2057_s22 = smov %s1569_s23  ;;  %s2058_s23 = smov %s1658_s30 }
 0xa58   : > { %s2059_s24 = smov %s1647_s27  ;;  %20 = sbr.rel (!%p18_p4) target bundleno = 5 (0x5), region = 98 }
 0xa5d   :  { %999 = vsyncpa [#allocation7], 1 }
 0xa5e   :  { %1001 = vsyncpa [#allocation7 + $0x1], 1 }
 0xa5f   :  { %1002 = vsyncpa [#allocation10], 1 }
 0xa60   :  { %1003 = vsyncpa [#allocation8], 1 }
 0xa61   :  { %1005 = vsyncpa [#allocation8 + $0x1], 1 }

</bundles_post_ra>
